<compile_context>
chip_gen: v7x
topology: tpu7x:2x2x1
jax: 0.10.0
libtpu: 0.0.40
codegen_flags: <defaults>
</compile_context>

<pallas_src>
import functools

import jax
import jax.numpy as jnp
from jax import lax
from jax.experimental import pallas as pl
from jax.experimental.pallas import tpu as pltpu

BN_EPS = 1e-5   # torch.nn.BatchNorm1d default
LANE = 128      # TPU lane width


def _round_up(v, m):
    return ((v + m - 1) // m) * m


def _check_vmem_budget(n, in_features, out_features, matmul_dtype):
    """Whole-array-residency guard (v7x: 64 MiB physical / 32 MiB scoped VMEM)."""
    itemsize = jnp.dtype(matmul_dtype).itemsize
    o_pad = _round_up(out_features, LANE)
    est = (
        2 * n * in_features * 4                # x resident + pass-through blocks
        + 2 * in_features * o_pad * itemsize   # W (double-buffered blocks, worst case)
        + 4 * n * o_pad * 4                    # h + elementwise temporaries / act
        + n * (o_pad + in_features) * 4        # output slab (fallback path worst case)
    )
    budget = 24 << 20
    if est > budget:
        raise ValueError(
            f"Residual kernel VMEM estimate {est / 2**20:.1f} MiB exceeds the "
            f"{budget >> 20} MiB whole-array-residency budget (v7x limit). "
            "Add an N-grid with per-column partial-sum BN accumulators (two-phase "
            "stats) plus the existing O-grid before reusing at these shapes."
        )


# ---------------------------------------------------------------------------
# Path A: fused kernel.  Output is the full concat([act, x], 1) slab.
# Requires out_features % 128 == 0 (the common CTGAN config, o = 256).
#
# 1-D grid over 128-wide lane blocks of the [N, o + i] output:
#   steps [0, g_act)         : act block   = relu(bn_train(x @ W[:, blk]))
#   steps [g_act, g_act+g_x) : pass-through block = x[:, blk - g_act]
# BN batch stats are per output column, so splitting O is exact (no cross-block
# reduction).  All stores are lane-aligned; ragged i is handled by Pallas edge
# masking on the final pass-through block.
# ---------------------------------------------------------------------------
def _fused_kernel(x_ref, x_pass_ref, w_ref, gamma_ref, beta_ref, out_ref, *,
                  g_act, inv_n, matmul_dtype):
    j = pl.program_id(0)

    @pl.when(j < g_act)
    def _act_block():
        # Linear (no bias): bias is exactly cancelled by the batch-mean subtract.
        x = x_ref[...].astype(matmul_dtype)
        h = jnp.dot(x, w_ref[...], preferred_element_type=jnp.float32)  # [N, 128] f32

        # Single-pass training-mode BatchNorm1d stats (biased /N variance).
        mean = jnp.sum(h, axis=0, keepdims=True) * inv_n
        meansq = jnp.sum(h * h, axis=0, keepdims=True) * inv_n
        var = jnp.maximum(meansq - mean * mean, 0.0)

        # Fold gamma/mean into one FMA: out = h*scale + shift, then ReLU.
        scale = lax.rsqrt(var + BN_EPS) * gamma_ref[...]
        shift = beta_ref[...] - mean * scale
        out_ref[...] = jnp.maximum(h * scale + shift, jnp.float32(0.0))

    @pl.when(j >= g_act)
    def _passthrough_block():
        out_ref[...] = x_pass_ref[...]


def _fused_forward(x, w_m, gamma_r, beta_r, *, out_features, matmul_dtype,
                   block_o=LANE):
    n, k = x.shape
    g_act = out_features // block_o          # out_features % 128 == 0 guaranteed
    g_x = pl.cdiv(k, block_o)
    last_act = g_act - 1

    kernel = functools.partial(
        _fused_kernel, g_act=g_act, inv_n=1.0 / n, matmul_dtype=matmul_dtype)

    in_specs = [
        # x, full block, resident across all steps (fetched once): MXU LHS.
        pl.BlockSpec((n, k), lambda j: (0, 0)),
        # x again, lane-blocked, used only by the pass-through steps (clamped
        # to block 0 during act steps -> no extra refetch).
        pl.BlockSpec((n, block_o), lambda j: (0, jnp.maximum(j - g_act, 0))),
        # W / gamma / beta blocked along O (clamped during pass-through steps).
        pl.BlockSpec((k, block_o), lambda j: (0, jnp.minimum(j, last_act))),
        pl.BlockSpec((1, block_o), lambda j: (0, jnp.minimum(j, last_act))),
        pl.BlockSpec((1, block_o), lambda j: (0, jnp.minimum(j, last_act))),
    ]
    out_specs = pl.BlockSpec((n, block_o), lambda j: (0, j))

    return pl.pallas_call(
        kernel,
        out_shape=jax.ShapeDtypeStruct((n, out_features + k), jnp.float32),
        grid=(g_act + g_x,),
        in_specs=in_specs,
        out_specs=out_specs,
        compiler_params=pltpu.CompilerParams(dimension_semantics=("parallel",)),
    )(x, x, w_m, gamma_r, beta_r)


# ---------------------------------------------------------------------------
# Path B (fallback, out_features % 128 != 0): gridless kernel on a lane-padded
# feature dim (single unmasked lane-dense store), concat done in XLA.
# ---------------------------------------------------------------------------
def _padded_kernel(x_ref, w_ref, gamma_ref, beta_ref, act_ref, *, inv_n,
                   matmul_dtype):
    x = x_ref[...].astype(matmul_dtype)
    h = jnp.dot(x, w_ref[...], preferred_element_type=jnp.float32)  # [N, O_pad]

    mean = jnp.sum(h, axis=0, keepdims=True) * inv_n
    meansq = jnp.sum(h * h, axis=0, keepdims=True) * inv_n
    var = jnp.maximum(meansq - mean * mean, 0.0)

    scale = lax.rsqrt(var + BN_EPS) * gamma_ref[...]
    shift = beta_ref[...] - mean * scale
    act_ref[...] = jnp.maximum(h * scale + shift, jnp.float32(0.0))


def _padded_forward(x, w_p, gamma_p, beta_p, *, out_features, matmul_dtype):
    n, _ = x.shape
    o_pad = w_p.shape[1]
    vmem = pl.BlockSpec(memory_space=pltpu.MemorySpace.VMEM)
    kernel = functools.partial(_padded_kernel, inv_n=1.0 / n,
                               matmul_dtype=matmul_dtype)
    act = pl.pallas_call(
        kernel,
        out_shape=jax.ShapeDtypeStruct((n, o_pad), jnp.float32),
        in_specs=[vmem] * 4,
        out_specs=vmem,
    )(x, w_p, gamma_p, beta_p)
    # Padded gamma/beta lanes are zero -> padded act columns are exactly 0 and
    # are sliced off here.  Concat stays in XLA only on this unaligned path.
    return jnp.concatenate([act[:, :out_features], x], axis=1)


# ---------------------------------------------------------------------------
# Public API: one-time parameter prep (hoisted off the per-forward path) that
# returns a jit-ready forward(x).
# ---------------------------------------------------------------------------
def make_residual_forward(w, b, gamma, beta, *, matmul_dtype=jnp.bfloat16):
    """Residual(i, o) forward builder: concat([relu(bn_train(x @ w + b)), x], 1).

    w: [i, o] f32 (torch fc.weight pre-transposed); b/gamma/beta: [o] f32.
    Returns forward(x: [N, i] f32) -> [N, o + i] f32.

    * `b` never reaches the kernel: training-mode BatchNorm subtracts the batch
      mean, which cancels a constant per-feature bias exactly.
    * Padding / dtype casting of parameters happens once, here, not per call.
    * Forward-training-mode only (batch stats); eval-mode BN is out of scope.
    """
    del b  # exact no-op for the normalized output (see docstring)
    in_features, out_features = w.shape
    fused = (out_features % LANE) == 0

    if fused:
        w_m = w.astype(matmul_dtype)
        gamma_r = gamma.reshape(1, out_features).astype(jnp.float32)
        beta_r = beta.reshape(1, out_features).astype(jnp.float32)

        def forward(x):
            _check_vmem_budget(x.shape[0], in_features, out_features, matmul_dtype)
            return _fused_forward(x, w_m, gamma_r, beta_r,
                                  out_features=out_features,
                                  matmul_dtype=matmul_dtype)
    else:
        o_pad = _round_up(out_features, LANE)
        pad_o = o_pad - out_features
        w_p = jnp.pad(w, ((0, 0), (0, pad_o))).astype(matmul_dtype)
        gamma_p = jnp.pad(gamma, (0, pad_o)).reshape(1, o_pad).astype(jnp.float32)
        beta_p = jnp.pad(beta, (0, pad_o)).reshape(1, o_pad).astype(jnp.float32)

        def forward(x):
            _check_vmem_budget(x.shape[0], in_features, out_features, matmul_dtype)
            return _padded_forward(x, w_p, gamma_p, beta_p,
                                   out_features=out_features,
                                   matmul_dtype=matmul_dtype)

    return forward


def _reference(x, w, b, gamma, beta):
    h = x @ w + b
    mean = jnp.mean(h, axis=0, keepdims=True)
    var = jnp.mean((h - mean) ** 2, axis=0, keepdims=True)
    bn = (h - mean) / jnp.sqrt(var + BN_EPS) * gamma + beta
    return jnp.concatenate([jnp.maximum(bn, 0.0), x], axis=1)


def _run_case(name, n, in_features, out_features, key):
    kx, kw, kb, kg, kbe = jax.random.split(key, 5)
    x = jax.random.normal(kx, (n, in_features), dtype=jnp.float32)
    bound = 1.0 / float(in_features) ** 0.5
    w = jax.random.uniform(kw, (in_features, out_features),
                           minval=-bound, maxval=bound, dtype=jnp.float32)
    b = jax.random.uniform(kb, (out_features,),
                           minval=-bound, maxval=bound, dtype=jnp.float32)
    gamma = 1.0 + 0.1 * jax.random.normal(kg, (out_features,), dtype=jnp.float32)
    beta = 0.1 * jax.random.normal(kbe, (out_features,), dtype=jnp.float32)

    ref = _reference(x, w, b, gamma, beta)

    # Exact-math variant (f32 MXU operands): tight tolerance.
    fwd_f32 = jax.jit(make_residual_forward(w, b, gamma, beta,
                                            matmul_dtype=jnp.float32))
    out_f32 = jax.block_until_ready(fwd_f32(x))
    assert out_f32.shape == (n, out_features + in_features), (name, out_f32.shape)
    assert jnp.allclose(out_f32, ref, atol=1e-4, rtol=1e-4), f"{name}: f32 mismatch"

    # Production variant (bf16 MXU operands, f32 accumulate): loose tolerance.
    fwd_bf16 = jax.jit(make_residual_forward(w, b, gamma, beta))
    out_bf16 = jax.block_until_ready(fwd_bf16(x))
    assert out_bf16.shape == (n, out_features + in_features), (name, out_bf16.shape)
    assert jnp.allclose(out_bf16, ref, atol=3e-2, rtol=3e-2), f"{name}: bf16 mismatch"


if __name__ == "__main__":
    key = jax.random.PRNGKey(0)
    k1, k2, k3 = jax.random.split(key, 3)

    # (a) Fused path, CTGAN-typical lane-aligned shapes (o % 128 == 0).
    _run_case("fused_aligned", n=16, in_features=128, out_features=256, key=k1)
    # (b) Fused path with a ragged input-feature pass-through (edge masking).
    _run_case("fused_ragged_i", n=12, in_features=160, out_features=128, key=k2)
    # (c) Fallback path: o not a multiple of 128 -> padded kernel + XLA concat.
    _run_case("padded_fallback", n=8, in_features=32, out_features=32, key=k3)

    print("KERNEL_OK")
</pallas_src>

<mosaic_0001>
module attributes {stable_mosaic.version = 11 : i64} {
  func.func @_fused_kernel(%arg0: i32, %arg1: memref<16x128xf32, #tpu.memory_space<vmem>>, %arg2: memref<16x128xf32, #tpu.memory_space<vmem>>, %arg3: memref<128x128xf32, #tpu.memory_space<vmem>>, %arg4: memref<1x128xf32, #tpu.memory_space<vmem>>, %arg5: memref<1x128xf32, #tpu.memory_space<vmem>>, %arg6: memref<16x128xf32, #tpu.memory_space<vmem>>) attributes {dimension_semantics = [#tpu.dimension_semantics<parallel>], iteration_bounds = array<i64: 3>, scalar_prefetch = 0 : i64, scratch_operands = 0 : i64, tpu.core_type = #tpu.core_type<tc>, window_params = [{pipeline_mode = #tpu.pipeline_mode<synchronous>, transform_indices = @transform_0, window_bounds = array<i64: 16, 128>}, {transform_indices = @transform_1, window_bounds = array<i64: 16, 128>}, {transform_indices = @transform_2, window_bounds = array<i64: 128, 128>}, {transform_indices = @transform_3, window_bounds = array<i64: 1, 128>}, {transform_indices = @transform_4, window_bounds = array<i64: 1, 128>}, {transform_indices = @transform_5, window_bounds = array<i64: 16, 128>}]} {
    %c2_i32 = arith.constant 2 : i32
    %0 = arith.cmpi slt, %arg0, %c2_i32 : i32
    %1 = arith.extui %0 : i1 to i32
    %c0_i32 = arith.constant 0 : i32
    %2 = arith.cmpi ne, %1, %c0_i32 : i32
    scf.if %2 {
      %c0 = arith.constant 0 : index
      %c0_2 = arith.constant 0 : index
      %6 = vector.load %arg1[%c0, %c0_2] : memref<16x128xf32, #tpu.memory_space<vmem>>, vector<16x128xf32>
      %c0_3 = arith.constant 0 : index
      %c0_4 = arith.constant 0 : index
      %7 = vector.load %arg3[%c0_3, %c0_4] : memref<128x128xf32, #tpu.memory_space<vmem>>, vector<128x128xf32>
      %cst = arith.constant dense<0.000000e+00> : vector<16x128xf32>
      %8 = tpu.matmul %6, %7, %cst {dimension_numbers = #tpu.dot_dimension_numbers<[1], [0], [0], [1], [0, 0, 1, 1], [], []>} : vector<16x128xf32>, vector<128x128xf32>, vector<16x128xf32> -> vector<16x128xf32>
      %cst_5 = arith.constant dense<0.000000e+00> : vector<128xf32>
      %9 = vector.multi_reduction <add>, %8, %cst_5 [0] : vector<16x128xf32> to vector<128xf32>
      %10 = vector.shape_cast %9 : vector<128xf32> to vector<1x128xf32>
      %cst_6 = arith.constant 6.250000e-02 : f32
      %11 = vector.broadcast %cst_6 : f32 to vector<1x128xf32>
      %12 = arith.mulf %10, %11 : vector<1x128xf32>
      %13 = arith.mulf %8, %8 : vector<16x128xf32>
      %cst_7 = arith.constant dense<0.000000e+00> : vector<128xf32>
      %14 = vector.multi_reduction <add>, %13, %cst_7 [0] : vector<16x128xf32> to vector<128xf32>
      %15 = vector.shape_cast %14 : vector<128xf32> to vector<1x128xf32>
      %cst_8 = arith.constant 6.250000e-02 : f32
      %16 = vector.broadcast %cst_8 : f32 to vector<1x128xf32>
      %17 = arith.mulf %15, %16 : vector<1x128xf32>
      %18 = arith.mulf %12, %12 : vector<1x128xf32>
      %19 = arith.subf %17, %18 : vector<1x128xf32>
      %cst_9 = arith.constant 0.000000e+00 : f32
      %20 = vector.broadcast %cst_9 : f32 to vector<1x128xf32>
      %21 = arith.maximumf %19, %20 : vector<1x128xf32>
      %cst_10 = arith.constant 9.99999974E-6 : f32
      %22 = vector.broadcast %cst_10 : f32 to vector<1x128xf32>
      %23 = arith.addf %21, %22 : vector<1x128xf32>
      %24 = math.rsqrt %23 : vector<1x128xf32>
      %c0_11 = arith.constant 0 : index
      %c0_12 = arith.constant 0 : index
      %25 = vector.load %arg4[%c0_11, %c0_12] : memref<1x128xf32, #tpu.memory_space<vmem>>, vector<1x128xf32>
      %26 = arith.mulf %24, %25 : vector<1x128xf32>
      %c0_13 = arith.constant 0 : index
      %c0_14 = arith.constant 0 : index
      %27 = vector.load %arg5[%c0_13, %c0_14] : memref<1x128xf32, #tpu.memory_space<vmem>>, vector<1x128xf32>
      %28 = arith.mulf %12, %26 : vector<1x128xf32>
      %29 = arith.subf %27, %28 : vector<1x128xf32>
      %30 = vector.broadcast %26 : vector<1x128xf32> to vector<16x128xf32>
      %31 = arith.mulf %8, %30 : vector<16x128xf32>
      %32 = vector.broadcast %29 : vector<1x128xf32> to vector<16x128xf32>
      %33 = arith.addf %31, %32 : vector<16x128xf32>
      %cst_15 = arith.constant 0.000000e+00 : f32
      %34 = vector.broadcast %cst_15 : f32 to vector<16x128xf32>
      %35 = arith.maximumf %33, %34 : vector<16x128xf32>
      %c0_16 = arith.constant 0 : index
      %c0_17 = arith.constant 0 : index
      %36 = vector.load %arg6[%c0_16, %c0_17] : memref<16x128xf32, #tpu.memory_space<vmem>>, vector<16x128xf32>
      tpu.vector_store %arg6[%c0_16, %c0_17], %35 {strides = array<i32>} : memref<16x128xf32, #tpu.memory_space<vmem>>, vector<16x128xf32>,
    } else {
    }
    %c2_i32_0 = arith.constant 2 : i32
    %3 = arith.cmpi sge, %arg0, %c2_i32_0 : i32
    %4 = arith.extui %3 : i1 to i32
    %c0_i32_1 = arith.constant 0 : i32
    %5 = arith.cmpi ne, %4, %c0_i32_1 : i32
    scf.if %5 {
      %c0 = arith.constant 0 : index
      %c0_2 = arith.constant 0 : index
      %6 = vector.load %arg2[%c0, %c0_2] : memref<16x128xf32, #tpu.memory_space<vmem>>, vector<16x128xf32>
      %c0_3 = arith.constant 0 : index
      %c0_4 = arith.constant 0 : index
      %7 = vector.load %arg6[%c0_3, %c0_4] : memref<16x128xf32, #tpu.memory_space<vmem>>, vector<16x128xf32>
      tpu.vector_store %arg6[%c0_3, %c0_4], %6 {strides = array<i32>} : memref<16x128xf32, #tpu.memory_space<vmem>>, vector<16x128xf32>,
    } else {
    }
    return
  }
  func.func @transform_0(%arg0: i32) -> (i32, i32) {
    %c0_i32 = arith.constant 0 : i32
    %c0_i32_0 = arith.constant 0 : i32
    %c0_i32_1 = arith.constant 0 : i32
    return %c0_i32, %c0_i32_0 : i32, i32
  }
  func.func @transform_1(%arg0: i32) -> (i32, i32) {
    %c2_i32 = arith.constant 2 : i32
    %0 = arith.subi %arg0, %c2_i32 : i32
    %c0_i32 = arith.constant 0 : i32
    %1 = arith.maxsi %0, %c0_i32 : i32
    %c0_i32_0 = arith.constant 0 : i32
    %c0_i32_1 = arith.constant 0 : i32
    return %c0_i32_0, %1 : i32, i32
  }
  func.func @transform_2(%arg0: i32) -> (i32, i32) {
    %c1_i32 = arith.constant 1 : i32
    %0 = arith.minsi %arg0, %c1_i32 : i32
    %c0_i32 = arith.constant 0 : i32
    %c0_i32_0 = arith.constant 0 : i32
    return %c0_i32, %0 : i32, i32
  }
  func.func @transform_3(%arg0: i32) -> (i32, i32) {
    %c1_i32 = arith.constant 1 : i32
    %0 = arith.minsi %arg0, %c1_i32 : i32
    %c0_i32 = arith.constant 0 : i32
    %c0_i32_0 = arith.constant 0 : i32
    return %c0_i32, %0 : i32, i32
  }
  func.func @transform_4(%arg0: i32) -> (i32, i32) {
    %c1_i32 = arith.constant 1 : i32
    %0 = arith.minsi %arg0, %c1_i32 : i32
    %c0_i32 = arith.constant 0 : i32
    %c0_i32_0 = arith.constant 0 : i32
    return %c0_i32, %0 : i32, i32
  }
  func.func @transform_5(%arg0: i32) -> (i32, i32) {
    %c0_i32 = arith.constant 0 : i32
    %c0_i32_0 = arith.constant 0 : i32
    return %c0_i32, %arg0 : i32, i32
  }
}

</mosaic_0001>

<bundles_post_ra>
// kernel: forward.1
= control target key start
LH: loop header
LB: loop body
LE: loop exit
PB: predicated region body
PF: predicated region fallthrough
CT: control target
= control target key end

     0   :  { %s1535_s0 = inlined_call_operand.hbm [shape: f32[16,128], index: 0, kind: input, shape index: {}, may-alias: {0,1}]   ;;  %s1536_s1 = inlined_call_operand.hbm [shape: f32[16,128], index: 1, kind: input, shape index: {}, may-alias: {0,1}]   ;;  %s1537_s2 = inlined_call_operand.hbm [shape: f32[128,256], index: 2, kind: input, shape index: {}]   ;;  %s1538_s3 = inlined_call_operand.vmem [shape: f32[1,256], index: 3, kind: input, shape index: {}]   ;;  %s1539_s4 = inlined_call_operand.vmem [shape: f32[1,256], index: 4, kind: input, shape index: {}]   ;;  %s1540_s5 = inlined_call_operand.hbm [shape: f32[16,384], index: 5, kind: output, shape index: {}]  }
   0x1   :  { %1561 = sst [smem:[#allocation21_spill]] %s1536_s1 }
   0x2   :  { %1562 = sst [smem:[#allocation22_spill]] %s1540_s5 }
   0x3   :  { %10 = vsyncpa [#allocation3], 0 }
   0x4   :  { %11 = vsyncpa [#allocation6], 0 }
   0x5   :  { %13 = vsyncpa [#allocation6 + $0x1], 0 }
   0x6   :  { %14 = vsyncpa [#allocation4], 0 }
   0x7   :  { %16 = vsyncpa [#allocation4 + $0x1], 0  ;;  %s1139_s18 = smov 0   ;;  %s1141_s19 = smov 0  }
   0x8   :  { %s1143_s20 = smov 0   ;;  %s1145_s21 = smov 0  }
   0x9   :  { %s1147_s22 = smov 0   ;;  %s1149_s23 = smov 0  }
   0xa   :  { %s1151_s24 = smov 0   ;;  %s1153_s25 = smov 0  }
   0xb   :  { %s1155_s26 = smov 0   ;;  %s1157_s27 = smov 0  }
   0xc LB: > { %1563 = sst [smem:[#allocation13_spill]] %s1061_s18  ;;  %s656_s28 = sadd.s32 4294967294, %s1097_s27   ;;  %s1097_s27 = sphi %s1157_s27, %s1612_s27   ;;  %s1093_s26 = sphi %s1155_s26, %s1604_s26   ;;  %s1089_s25 = sphi %s1153_s25, %s1611_s25   ;;  %s1085_s24 = sphi %s1151_s24, %s1610_s24   ;;  %s1081_s23 = sphi %s1149_s23, %s1609_s23   ;;  %s1077_s22 = sphi %s1147_s22, %s1608_s22   ;;  %s1073_s21 = sphi %s1145_s21, %s1607_s21   ;;  %s1069_s20 = sphi %s1143_s20, %s1601_s20   ;;  %s1065_s19 = sphi %s1141_s19, %s1606_s19   ;;  %s1061_s18 = sphi %s1139_s18, %s1605_s18  }
   0xd   : > { %1564 = sst [smem:[#allocation14_spill]] %s1069_s20  ;;  %s1191_s29 = sadd.s32 1, %s1097_s27  }
   0xe   : > { %1565 = sst [smem:[#allocation15_spill]] %s1093_s26  ;;  %p48_p0 = scmp.gt.s32.totalorder %s656_s28, 0 }
   0xf   : > { %1566 = sst [smem:[#allocation16_spill]] %s1097_s27  ;;  %s658_s30 = sadd.s32 4294967294, %s1191_s29 }
  0x10   : > { %p51_p1 = scmp.gt.s32.totalorder %s658_s30, 0  ;;  %s56_s6 = sadd.s32 1, %s1093_s26 }
  0x11   : > { %s49_s7 = scalar_select %p48_p0, %s656_s28, 0 }
  0x12   : > { %s1614_s30 = smov (!%p51_p1, %s658_s30), 0  ;;  %p63_p2 = scmp.ne.s32.totalorder %s1093_s26, %s1089_s25 }
  0x13   : > { %p1542_p3 = scmp.eq.s32.totalorder %s1097_s27, 0  ;;  %s53_s8 = ssub.s32 %s49_s7, %s1614_s30 }
  0x14   : > { %s169_s9 = ssub.s32 %s1097_s27, %s1191_s29  ;;  %p54_p4 = scmp.eq.s32.totalorder %s53_s8, 0 }
  0x15   : > { %p1202_p5 = por %p1542_p3, %p63_p2  ;;  %p1206_p6 = scmp.eq.s32.totalorder %s169_s9, 0 }
  0x16   : > { %p188_p7 = scmp.ne.s32.totalorder %s1065_s19, %s1061_s18  ;;  %p189_p8 = scmp.eq.s32.totalorder %s656_s28, 2 }
  0x17   : > { %s1213_s12 = scalar_select %p54_p4, %s1093_s26, %s56_s6  }
  0x18   : > { %p1215_p9 = por %p189_p8, %p188_p7  ;;  %p1541_p10 = scmp.lt.s32.totalorder %s1097_s27, 3 }
  0x19   : > { %1569 = sst [smem:[#allocation17_spill]] %s1213_s12  ;;  %s222_s14 = sand.u32 1, %s1097_s27  }
  0x1a   : > { %s1570_s13 = scalar_select %p1215_p9, 1, 0 }
  0x1b   : > { %s224_s15 = sand.u32 1, %s1093_s26   ;;  %s664_s17 = sshll.u32 %s49_s7, 7 }
  0x1c   : > { %1571 = sst [smem:[#allocation18_spill]] %s1570_s13  ;;  %s662_s16 = sshll.u32 %s224_s15, 4 }
  0x1d   : > { %s1572_s1 = sld [smem:[#allocation21_spill]]  ;;  %s226_s6 = scalar_lea.vmem [#allocation5], %s662_s16 }
  0x1e   : > { %s235_s28 = sshll.u32 %s226_s6, 4  ;;  %p1233_p11 = pnand %p1541_p10, %p1202_p5  ;;  %s1227_s28 = int_to_ptr.vmem [resolvable:$true] %s235_s28 }
  0x1f   : > { %s1237_s7 = scalar_lea.sflag [#allocation6], %s222_s14 }
  0x20   : > { %p889_p13 = pneg %p1233_p11 }
  0x23   : > { %s1225_s9 = scalar_lea.hbm %s1572_s1, %s664_s17  ;;  %s892_s10 = scalar_lea.hbm %s1572_s1, 256 }
  0x24   : > { %s887_s15 = scalar_lea.hbm %s1225_s9, 256  ;;  %p893_p2 = scmp.lt.u32.totalorder %s1225_s9, %s1572_s1 }
  0x25   : > { %p888_p12 = scmp.ne.s32.totalorder %s1225_s9, %s887_s15  ;;  %p894_p4 = scmp.lt.u32.totalorder %s892_s10, %s887_s15 }
  0x26   : > { %p896_p7 = scmp.lt.u32.totalorder %s887_s15, %s1225_s9 }
  0x27   : > { %p890_p0 = pnand %p889_p13, %p888_p12  ;;  %p895_p5 = por %p894_p4, %p893_p2 }
  0x29   : > { %p891_p1 = pneg %p890_p0  ;;  %p897_p8 = por %p896_p7, %p895_p5 }
  0x2b   : > { %p898_p10 = pnand %p897_p8, %p891_p1 }
  0x2d   : > { %901 = shalt.err (!%p898_p10)
}
  0x2e   : > { %s902_s14 = scalar_lea.vmem %s1227_s28, 256  ;;  %s1099_s6 = smov [#allocation5]  }
  0x2f   : > { %p903_p12 = scmp.ne.s32.totalorder %s1227_s28, %s902_s14  ;;  %s907_s16 = sshll.u32 %s1099_s6, 4  ;;  %s908_s16 = int_to_ptr.vmem [resolvable:$false] %s907_s16 }
  0x30   : > { %s909_s17 = scalar_lea.vmem %s908_s16, 512  ;;  %p910_p9 = scmp.lt.s32.totalorder %s1227_s28, %s908_s16 }
  0x31   : > { %p905_p0 = pnand %p903_p12, %p889_p13  ;;  %p911_p2 = scmp.lt.s32.totalorder %s909_s17, %s902_s14 }
  0x33   : > { %p906_p3 = pneg %p905_p0  ;;  %p912_p4 = por %p911_p2, %p910_p9 }
  0x35   : > { %p913_p5 = pnand %p912_p4, %p906_p3 }
  0x37   : > { %916 = shalt.err (!%p913_p5)
}
  0x38   : > { %s1543_s15 = smov 128   ;;  %s1545_s10 = smov 8  }
  0x39   : > { %786 = dma.hbm_to_vmem [thread:$0]  (!%p1233_p11), %s1225_s9, 256, %s1227_s28, %s1237_s7, %s1543_s15, %s1543_s15, %s1545_s10  }
  0x3a   : > { %s1269_s30 = sadd.s32 4294967295, %s1097_s27   ;;  %p69_p3 = scmp.ne.s32.totalorder %s1089_s25, %s1085_s24 }
  0x3b   : > { %p1549_p9 = scmp.eq.s32.totalorder %s1269_s30, 0  ;;  %p93_p10 = scmp.ne.s32.totalorder %s1081_s23, %s1077_s22 }
  0x3c   : > { %p99_p13 = scmp.ne.s32.totalorder %s1077_s22, %s1073_s21  ;;  %s172_s12 = sadd.s32 1, %s1069_s20 }
  0x3d   : > { %p1280_p1 = por %p1549_p9, %p69_p3  ;;  %p1575_p7 = scmp.eq.s32.totalorder %s1097_s27, 0 }
  0x3e   : > { %p1289_p8 = por %p99_p13, %p1549_p9  ;;  %p182_p12 = scmp.ne.s32.totalorder %s1069_s20, %s1065_s19 }
  0x3f   : > { %s1574_s8 = scalar_select %p1280_p1, 1, 0 }
  0x40   : > { %p95_p11 = por %p93_p10, %p1575_p7  ;;  %p183_p0 = scmp.eq.s32.totalorder %s1269_s30, 2 }
  0x41   : > { %s1576_s9 = scalar_select %p1289_p8, 1, 0 }
  0x42   : > { %s1296_s24 = scalar_select %p1206_p6, %s1069_s20, %s172_s12  }
  0x43   : > { %p659_p2 = scmp.ge.s32.totalorder %s1097_s27, 1  ;;  %p196_p4 = scmp.lt.s32.totalorder %s1097_s27, 4 }
  0x44   : > { %1577 = sst [smem:[#allocation19_spill]] %s1296_s24  ;;  %p1303_p5 = por %p183_p0, %p182_p12 }
  0x45   : > { %p1307_p3 = pnand %p659_p2, %p196_p4  ;;  %s1102_s14 = smov [#allocation2]  }
  0x46   : > { %s1578_s21 = scalar_select %p1303_p5, 1, 0 }
  0x47   : > { %s1580_s28 = scalar_select %p1307_p3, 1, 0 }
  0x48   : > { %1579 = sst [smem:[#allocation20_spill]] %s1578_s21  ;;  %s208_s6 = sshll.u32 %s1102_s14, 4  ;;  %s209_s6 = int_to_ptr.vmem [resolvable:$true] %s208_s6 }
  0x49   : > { %p1581_p10 = scmp.lt.s32.totalorder %s1097_s27, 3  ;;  %p779_p6 = pneg %p1307_p3 }
  0x4a   : > { %p79_p7 = scmp.lt.s32.totalorder %s1097_s27, 1  ;;  %s86_s12 = sadd.s32 1, %s1081_s23 }
  0x4b   : > { %p1313_p13 = pnand %p1581_p10, %p95_p11  ;;  %p1322_p12 = pnand %p779_p6, %p1549_p9 }
  0x4c   : > { %s80_s17 = scalar_select %p79_p7, %s1097_s27, 1 }
  0x4d   : > { %s1582_s11 = scalar_select %p1313_p13, 1, 0 }
  0x4e   : > { %s917_s10 = scalar_lea.hbm %s1535_s0, 256  ;;  %p919_p2 = pneg %p1322_p12 }
  0x4f   : > { %p918_p11 = scmp.ne.s32.totalorder %s1535_s0, %s917_s10  ;;  %p924_p6 = scmp.lt.u32.totalorder %s917_s10, %s1535_s0 }
  0x51   : > { %p920_p4 = pnand %p919_p2, %p918_p11 }
  0x53   : > { %p921_p10 = pneg %p920_p4 }
  0x55   : > { %p926_p9 = pnand %p924_p6, %p921_p10 }
  0x57   : > { %929 = shalt.err (!%p926_p9)
}
  0x58   : > { %s930_s13 = scalar_lea.vmem %s209_s6, 256  ;;  %p938_p8 = scmp.lt.s32.totalorder %s209_s6, %s209_s6 }
  0x59   : > { %p931_p7 = scmp.ne.s32.totalorder %s209_s6, %s930_s13  ;;  %p939_p1 = scmp.lt.s32.totalorder %s930_s13, %s930_s13 }
  0x5b   : > { %p933_p0 = pnand %p931_p7, %p919_p2  ;;  %p940_p3 = por %p939_p1, %p938_p8 }
  0x5d   : > { %p934_p5 = pneg %p933_p0 }
  0x5f   : > { %p941_p13 = pnand %p940_p3, %p934_p5 }
  0x61   : > { %944 = shalt.err (!%p941_p13)
}
  0x62   : > { %s1584_s1 = smov 8   ;;  %s1585_s26 = smov 128  }
  0x63   : > { %782 = dma.hbm_to_vmem [thread:$0]  (!%p1322_p12), %s1535_s0, 256, %s209_s6, [#allocation3], %s1585_s26, %s1585_s26, %s1584_s1  }
  0x64   : > { %p1586_p9 = scmp.lt.s32.totalorder %s1191_s29, 1  ;;  %s247_s13 = sand.u32 1, %s1081_s23  }
  0x65   : > { %s666_s10 = sshll.u32 %s80_s17, 7  ;;  %s665_s18 = sshll.u32 %s247_s13, 7 }
  0x66   : > { %s82_s20 = scalar_select %p1586_p9, %s1191_s29, 1 }
  0x67   : > { %s1355_s5 = scalar_lea.hbm %s1537_s2, %s666_s10  ;;  %s249_s15 = scalar_lea.vmem [#allocation7], %s665_s18 }
  0x68   : > { %s83_s24 = ssub.s32 %s80_s17, %s82_s20  ;;  %s257_s14 = sshll.u32 %s249_s15, 4  ;;  %s1360_s14 = int_to_ptr.vmem [resolvable:$true] %s257_s14 }
  0x69   : > { %p84_p1 = scmp.eq.s32.totalorder %s83_s24, 0  ;;  %s945_s6 = scalar_lea.hbm %s1355_s5, 2048 }
  0x6a   : > { %p946_p8 = scmp.ne.s32.totalorder %s1355_s5, %s945_s6  ;;  %p1587_p5 = scmp.ne.s32.totalorder %s1582_s11, 0 }
  0x6b   : > { %s1358_s21 = scalar_select %p84_p1, %s1081_s23, %s86_s12  }
  0x6c   : > { %p947_p3 = pneg %p1587_p5  ;;  %s950_s20 = scalar_lea.hbm %s1537_s2, 4096 }
  0x6d   : > { %p951_p0 = scmp.lt.u32.totalorder %s1355_s5, %s1537_s2  ;;  %p952_p11 = scmp.lt.u32.totalorder %s950_s20, %s945_s6 }
  0x6e   : > { %p948_p13 = pnand %p947_p3, %p946_p8  ;;  %p954_p4 = scmp.lt.u32.totalorder %s945_s6, %s1355_s5 }
  0x6f   : > { %p953_p2 = por %p952_p11, %p951_p0 }
  0x70   : > { %p949_p12 = pneg %p948_p13 }
  0x71   : > { %p955_p10 = por %p954_p4, %p953_p2 }
  0x73   : > { %p956_p6 = pnand %p955_p10, %p949_p12 }
  0x75   : > { %959 = shalt.err (!%p956_p6)
}
  0x76   : > { %s960_s18 = scalar_lea.vmem %s1360_s14, 2048  ;;  %s1103_s12 = smov [#allocation7]  }
  0x77   : > { %p961_p7 = scmp.ne.s32.totalorder %s1360_s14, %s960_s18  ;;  %s965_s24 = sshll.u32 %s1103_s12, 4  ;;  %s966_s24 = int_to_ptr.vmem [resolvable:$false] %s965_s24 }
  0x78   : > { %s967_s16 = scalar_lea.vmem %s966_s24, 4096  ;;  %p968_p8 = scmp.lt.s32.totalorder %s1360_s14, %s966_s24 }
  0x79   : > { %p963_p9 = pnand %p961_p7, %p947_p3  ;;  %p969_p13 = scmp.lt.s32.totalorder %s967_s16, %s960_s18 }
  0x7b   : > { %p964_p1 = pneg %p963_p9  ;;  %p970_p0 = por %p969_p13, %p968_p8 }
  0x7d   : > { %p971_p11 = pnand %p970_p0, %p964_p1 }
  0x7f   : > { %974 = shalt.err (!%p971_p11)
}
  0x80   : > { %s1104_s15 = smov 256   ;;  %p1588_p3 = scmp.ne.s32.totalorder %s1580_s28, 0 }
  0x81   : > { %789 = dma.hbm_to_vmem [thread:$0]  (!%p1587_p5), %s1355_s5, 2048, %s1360_s14, %s1237_s7, %s1104_s15, %s1585_s26, %s1584_s1  }
  0x82   : > { %289 = sbr.rel (%p1588_p3) target bundleno = 484 (0x1e4), region = 40  ;;  %p1589_p12 = scmp.eq.s32.totalorder (!%p1588_p3), %s1269_s30, 0 }
  0x89   : > { %1044 = dma.done.wait (%p1589_p12), [#allocation3], 256   ;;  %p1590_p2 = pmov %p1589_p12 }
  0x8a   : > { %s295_s6 = sand.u32 1, %s1269_s30   ;;  %s297_s11 = sand.u32 1, %s1089_s25  }
  0x8b   : > { %1046 = vsyncadd (%p1590_p2), [#allocation3], 4294967040  ;;  %s1398_s27 = sshll.u32 %s297_s11, 4  ;;  %s296_s17 = scalar_lea.sflag [#allocation6], %s295_s6 }
  0x8c   : > { %s299_s20 = scalar_lea.vmem [#allocation5], %s1398_s27  ;;  %p1591_p5 = scmp.ne.s32.totalorder %s1574_s8, 0 }
  0x8e   : > { %1048 = dma.done.wait (%p1591_p5), %s296_s17, 256  }
  0x8f   : > { %1050 = vsyncadd (%p1591_p5), %s296_s17, 4294967040  ;;  %s306_s5 = sand.u32 1, %s1077_s22   ;;  %p1592_p4 = scmp.ne.s32.totalorder %s1576_s9, 0 }
  0x90   : > { %s670_s7 = sshll.u32 %s306_s5, 7 }
  0x91   : > { %s1406_s28 = scalar_lea.vmem [#allocation7], %s670_s7 }
  0x92   : > { %1052 = dma.done.wait (%p1592_p4), %s296_s17, 2048  }
  0x93   : > { %1054 = vsyncadd (%p1592_p4), %s296_s17, 4294965248  ;;  %s347_s1 = sand.u32 1, %s1065_s19   ;;  %p355_p10 = scmp.lt.s32.totalorder %s1269_s30, 1 }
  0x94   : > { %s671_s8 = sshll.u32 %s347_s1, 4  ;;  %p678_p6 = scmp.ge.s32.totalorder %s1269_s30, 2 }
  0x95   : > { %s356_s26 = scalar_select %p355_p10, %s1269_s30, 1 }
  0x96   : > { %s1427_s24 = scalar_lea.vmem [#allocation8], %s671_s8  ;;  %372 = sbr.rel (%p678_p6) target bundleno = 446 (0x1be), region = 56  ;;  %v375_v0 = vld [vmem:[%s1406_s28] sm:$0xff] (!%p678_p6)  ;;  %v376_v1 = vld [vmem:[%s1406_s28 + $0x8] sm:$0xff] (!%p678_p6)  ;;  %v377_v2 = vld [vmem:[%s1406_s28 + $0x10] sm:$0xff] (!%p678_p6)  ;;  %v494_v50 = vlaneseq (!%p678_p6) }
  0x97   : > { %s1616_s26 = smov (!%p355_p10, %s356_s26), 1  ;;  %v737_v3 = vpack.c.bf16 (!%p678_p6), %v376_v1, %v375_v0  ;;  %v378_v4 = vld [vmem:[%s1406_s28 + $0x18] sm:$0xff] (!%p678_p6)  ;;  %v379_v6 = vld [vmem:[%s1406_s28 + $0x20] sm:$0xff] (!%p678_p6)  ;;  %v380_v7 = vld [vmem:[%s1406_s28 + $0x28] sm:$0xff] (!%p678_p6) }
  0x98   : > { %s359_s10 = scalar_lea.vmem %s1538_s3, %s1616_s26  ;;  %s366_s12 = scalar_lea.vmem %s1539_s4, %s1616_s26  ;;  %v741_v5 = vpack.c.bf16 (!%p678_p6), %v378_v4, %v377_v2  ;;  %v745_v8 = vpack.c.bf16 (!%p678_p6), %v380_v7, %v379_v6  ;;  %v373_v9 = vld [vmem:[#allocation2] sm:$0xff] (!%p678_p6)  ;;  %v382_v11 = vld [vmem:[%s1406_s28 + $0x38] sm:$0xff] (!%p678_p6)  ;;  %v383_v13 = vld [vmem:[%s1406_s28 + $0x40] sm:$0xff] (!%p678_p6)  ;;  %v495_v51 = vshrl.u32 (!%p678_p6), %v494_v50, 7 }
  0x99   : > { %738 = vmatprep.subr.bf16.mxu0 (!%p678_p6), %v737_v3  ;;  %v381_v10 = vld [vmem:[%s1406_s28 + $0x30] sm:$0xff] (!%p678_p6)  ;;  %734 = vmatprep.mubr.f32.mxu0 (!%p678_p6), %v373_v9  ;;  %v384_v14 = vld [vmem:[%s1406_s28 + $0x48] sm:$0xff] (!%p678_p6)  ;;  %v386_v17 = vld [vmem:[%s1406_s28 + $0x58] sm:$0xff] (!%p678_p6) }
  0x9a   : > { %740 = vmatpush3.bf16.msra.mxu0 (!%p678_p6), %v737_v3  ;;  %v749_v12 = vpack.c.bf16 (!%p678_p6), %v382_v11, %v381_v10  ;;  %v753_v15 = vpack.c.bf16 (!%p678_p6), %v384_v14, %v383_v13  ;;  %v385_v16 = vld [vmem:[%s1406_s28 + $0x50] sm:$0xff] (!%p678_p6)  ;;  %v387_v19 = vld [vmem:[%s1406_s28 + $0x60] sm:$0xff] (!%p678_p6)  ;;  %v388_v20 = vld [vmem:[%s1406_s28 + $0x68] sm:$0xff] (!%p678_p6)  ;;  %v496_v53 = vsub.s32 (!%p678_p6), 0, %v495_v51 }
  0x9b   : > { %742 = vmatprep.subr.bf16.mxu0 (!%p678_p6), %v741_v5  ;;  %v757_v18 = vpack.c.bf16 (!%p678_p6), %v386_v17, %v385_v16  ;;  %v761_v21 = vpack.c.bf16 (!%p678_p6), %v388_v20, %v387_v19  ;;  %v389_v22 = vld [vmem:[%s1406_s28 + $0x70] sm:$0xff] (!%p678_p6)  ;;  %v390_v23 = vld [vmem:[%s1406_s28 + $0x78] sm:$0xff] (!%p678_p6) }
  0x9c   : > { %v765_v24 = vpack.c.bf16 (!%p678_p6), %v390_v23, %v389_v22  ;;  %v374_v25 = vld [vmem:[#allocation2 + $0x8] sm:$0xff] (!%p678_p6)  ;;  %v489_v52 = vld [vmem:[%s359_s10] sm:$0x1] (!%p678_p6) }
  0x9d   : > { %v491_v56 = vld [vmem:[%s366_s12] sm:$0x1] }
  0x9e   : > { %744 = vmatpush3.bf16.msra.mxu0 %v741_v5 }
  0x9f   : > { %746 = vmatprep.subr.bf16.mxu0 %v745_v8 }
  0xa2   : > { %748 = vmatpush3.bf16.msra.mxu0 %v745_v8 }
  0xa3   : > { %750 = vmatprep.subr.bf16.mxu0 %v749_v12 }
  0xa6   : > { %752 = vmatpush3.bf16.msra.mxu0 %v749_v12 }
  0xa7   : > { %754 = vmatprep.subr.bf16.mxu0 %v753_v15 }
  0xaa   : > { %756 = vmatpush3.bf16.msra.mxu0 %v753_v15 }
  0xab   : > { %758 = vmatprep.subr.bf16.mxu0 %v757_v18 }
  0xae   : > { %760 = vmatpush3.bf16.msra.mxu0 %v757_v18 }
  0xaf   : > { %762 = vmatprep.subr.bf16.mxu0 %v761_v21 }
  0xb2   : > { %764 = vmatpush3.bf16.msra.mxu0 %v761_v21 }
  0xb3   : > { %766 = vmatprep.subr.bf16.mxu0 %v765_v24 }
  0xb6   : > { %768 = vmatpush3.bf16.msra.mxu0 %v765_v24 }
  0xb9   : > { %735 = vmatmul.mubr.f32.vlgmr.msra.gmra.mrb[0].mxu0 %v374_v25 }
 0x18c   : > { %v736_v26 = vpop.f32.mrb[0].mxu0 }
 0x18d   : > { %v475_v27 = vmul.f32 %v736_v26, %v736_v26  ;;  %v457_v28 = vpop.f32.mrb[1].mxu0 }
 0x18e   : > { %v466_v29 = vadd.f32 %v736_v26, %v457_v28  ;;  %v474_v30 = vmul.f32 %v457_v28, %v457_v28 }
 0x190   : > { %v467_v31 = vrot.slane %v466_v29, 4  ;;  %v476_v32 = vadd.f32 %v475_v27, %v474_v30 }
 0x192   : > { %v468_v33 = vadd.f32 %v467_v31, %v466_v29  ;;  %v477_v34 = vrot.slane %v476_v32, 4 }
 0x194   : > { %v469_v35 = vrot.slane %v468_v33, 2  ;;  %v478_v36 = vadd.f32 %v477_v34, %v476_v32 }
 0x196   : > { %v470_v37 = vadd.f32 %v469_v35, %v468_v33  ;;  %v479_v38 = vrot.slane %v478_v36, 2 }
 0x198   : > { %v471_v39 = vrot.slane %v470_v37, 1  ;;  %v480_v40 = vadd.f32 %v479_v38, %v478_v36 }
 0x19a   : > { %v472_v41 = vadd.f32 %v471_v39, %v470_v37  ;;  %v481_v42 = vrot.slane %v480_v40, 1 }
 0x19c   : > { %v473_v43 = vmul.f32 0.0625, %v472_v41  ;;  %v482_v44 = vadd.f32 %v481_v42, %v480_v40 }
 0x19e   : > { %v483_v45 = vmul.f32 0.0625, %v482_v44  ;;  %v484_v46 = vmul.f32 %v473_v43, %v473_v43 }
 0x1a0   : > { %v485_v47 = vsub.f32 %v483_v45, %v484_v46 }
 0x1a2   : > { %v486_v48 = vmax.f32 %v485_v47, 0.0 }
 0x1a4   : > { %v487_v49 = vadd.f32 1e-05, %v486_v48 }
 0x1a6   : > { %885 = vrsqrt.f32 %v487_v49 }
 0x1b0   : > { %v886_v54 = vpop.eup %885 }
 0x1b1   : > { %v490_v55 = vmul.f32 %v886_v54, %v489_v52 }
 0x1b3   : > { %v492_v57 = vmul.f32 %v490_v55, %v473_v43  ;;  %v497_v58 = vrot.slane %v490_v55, %v496_v53 }
 0x1b5   : > { %v493_v59 = vsub.f32 %v491_v56, %v492_v57  ;;  %v498_v60 = vmul.f32 %v497_v58, %v457_v28  ;;  %v499_v61 = vmul.f32 %v736_v26, %v497_v58 }
 0x1b7   : > { %v504_v62 = vrot.slane %v493_v59, %v496_v53 }
 0x1b9   : > { %v506_v63 = vadd.f32 %v504_v62, %v498_v60  ;;  %v507_v0 = vadd.f32 %v504_v62, %v499_v61 }
 0x1bb   : > { %v508_v1 = vmax.f32 %v506_v63, 0.0  ;;  %v509_v2 = vmax.f32 %v507_v0, 0.0 }
 0x1bd   : > { %510 = vst [vmem:[%s1427_s24] sm:$0xff] %v508_v1  ;;  %511 = vst [vmem:[%s1427_s24 + $0x8] sm:$0xff] %v509_v2 }
 0x1be PF: > { %p679_p7 = scmp.lt.s32.totalorder %s1269_s30, 2 }
 0x1bf   : > { %v516_v3 = vld [vmem:[%s299_s20] sm:$0xff] (!%p679_p7)  ;;  %v517_v4 = vld [vmem:[%s299_s20 + $0x8] sm:$0xff] (!%p679_p7) }
 0x1c0   : > { %515 = sbr.rel (%p679_p7) target bundleno = 455 (0x1c7), region = 60  ;;  %518 = vst [vmem:[%s1427_s24] sm:$0xff] (!%p679_p7), %v516_v3  ;;  %519 = vst [vmem:[%s1427_s24 + $0x8] sm:$0xff] (!%p679_p7), %v517_v4 }
 0x1c7 PF: > { %s1593_s17 = sld [smem:[#allocation20_spill]]  ;;  %s681_s5 = sshll.u32 %s1269_s30, 7 }
 0x1c8   : > { %s1594_s8 = sld [smem:[#allocation22_spill]]  ;;  %s533_s14 = sshll.u32 %s1427_s24, 4  ;;  %s1472_s14 = int_to_ptr.vmem [resolvable:$true] %s533_s14 }
 0x1c9   : > { %s1476_s27 = scalar_lea.sflag [#allocation4], %s347_s1  ;;  %s975_s20 = scalar_lea.vmem %s1472_s14, 256 }
 0x1ca   : > { %p976_p9 = scmp.ne.s32.totalorder %s1472_s14, %s975_s20  ;;  %s1105_s30 = smov [#allocation8]  }
 0x1cb   : > { %s979_s13 = sshll.u32 %s1105_s30, 4  ;;  %s980_s13 = int_to_ptr.vmem [resolvable:$false] %s979_s13 }
 0x1cc   : > { %s981_s10 = scalar_lea.vmem %s980_s13, 512  ;;  %p982_p0 = scmp.lt.s32.totalorder %s1472_s14, %s980_s13 }
 0x1cd   : > { %p1595_p1 = scmp.ne.s32.totalorder %s1593_s17, 0  ;;  %p983_p11 = scmp.lt.s32.totalorder %s981_s10, %s975_s20 }
 0x1ce   : > { %s1469_s26 = scalar_lea.hbm %s1594_s8, %s681_s5 }
 0x1cf   : > { %p977_p8 = pnand %p976_p9, %p1595_p1  ;;  %p984_p3 = por %p983_p11, %p982_p0 }
 0x1d1   : > { %p978_p13 = pneg %p977_p8 }
 0x1d3   : > { %p985_p12 = pnand %p984_p3, %p978_p13 }
 0x1d5   : > { %988 = shalt.err (!%p985_p12)
}
 0x1d6   : > { %s989_s1 = scalar_lea.hbm %s1469_s26, 256  ;;  %s993_s12 = scalar_lea.hbm %s1594_s8, 768 }
 0x1d7   : > { %p990_p2 = scmp.ne.s32.totalorder %s1469_s26, %s989_s1  ;;  %p994_p10 = scmp.lt.u32.totalorder %s1469_s26, %s1594_s8 }
 0x1d8   : > { %p995_p6 = scmp.lt.u32.totalorder %s993_s12, %s989_s1  ;;  %p997_p9 = scmp.lt.u32.totalorder %s989_s1, %s1469_s26 }
 0x1d9   : > { %p991_p5 = pnand %p990_p2, %p1595_p1 }
 0x1da   : > { %p996_p7 = por %p995_p6, %p994_p10 }
 0x1db   : > { %p992_p4 = pneg %p991_p5 }
 0x1dc   : > { %p998_p8 = por %p997_p9, %p996_p7 }
 0x1de   : > { %p999_p13 = pnand %p998_p8, %p992_p4 }
 0x1e0   : > { %1002 = shalt.err (!%p999_p13)
}
 0x1e1   : > { %s1106_s15 = smov 128   ;;  %s1107_s6 = smov 384  }
 0x1e2   : > { %s1108_s11 = smov 8  }
 0x1e3   : > { %777 = dma.vmem_to_hbm [thread:$0]  (%p1595_p1), %s1472_s14, 256, %s1469_s26, %s1476_s27, %s1106_s15, %s1107_s6, %s1108_s11  }
 0x1e4 PF: > { %s1596_s5 = sld [smem:[#allocation16_spill]]  ;;  %s1597_s7 = sld [smem:[#allocation13_spill]] }
 0x1e5   : > { %s1598_s28 = sld [smem:[#allocation18_spill]] }
 0x1ea   : > { %p797_p0 = scmp.ge.s32.totalorder %s1596_s5, 2  ;;  %s548_s20 = sand.u32 1, %s1597_s7  }
 0x1eb   : > { %p1599_p11 = scmp.ne.s32.totalorder %s1598_s28, 0  ;;  %s549_s30 = scalar_lea.sflag [#allocation4], %s548_s20 }
 0x1ed   : > { %p791_p3 = pnand %p797_p0, %p1599_p11 }
 0x1ef   : > { %1056 = dma.done.wait (!%p791_p3), %s549_s30, 256  }
 0x1f0   : > { %1058 = vsyncadd (!%p791_p3), %s549_s30, 4294967040  ;;  %s1600_s13 = sld [smem:[#allocation14_spill]]  ;;  %s1601_s20 = sld [smem:[#allocation19_spill]] }
 0x1f1   : > { %s1602_s10 = smov %s1358_s21  ;;  %s1603_s17 = sld [smem:[#allocation15_spill]] }
 0x1f2   : > { %s1604_s26 = sld [smem:[#allocation17_spill]]  ;;  %p19_p1 = scmp.ge.s32.totalorder %s1191_s29, 5  }
 0x1f3   : > { %s1605_s18 = smov %s1065_s19  ;;  %s1607_s21 = smov %s1077_s22 }
 0x1f4   : > { %s1608_s22 = smov %s1081_s23  ;;  %s1609_s23 = smov %s1602_s10 }
 0x1f5   : > { %s1610_s24 = smov %s1089_s25  ;;  %s1612_s27 = smov %s1191_s29 }
 0x1f6   : > { %s1606_s19 = smov %s1600_s13  ;;  %21 = sbr.rel (!%p19_p1) target bundleno = 12 (0xc), region = 115 }
 0x1f7   : > { %s1611_s25 = smov %s1603_s17 }
 0x1fd   :  { %554 = vsyncpa [#allocation3], 1 }
 0x1fe   :  { %556 = vsyncpa [#allocation3 + $0x1], 1 }
 0x1ff   :  { %557 = vsyncpa [#allocation6], 1 }
 0x200   :  { %559 = vsyncpa [#allocation6 + $0x1], 1 }
 0x201   :  { %560 = vsyncpa [#allocation4], 1 }
 0x202   :  { %562 = vsyncpa [#allocation4 + $0x1], 1 }

</bundles_post_ra>
